<compile_context>
chip_gen: v7x
topology: tpu7x:2x2x1
jax: 0.10.0
libtpu: 0.0.40
codegen_flags: <defaults>
</compile_context>

<pallas_src>
import jax
import jax.numpy as jnp
from jax.experimental import pallas as pl
from jax.experimental.pallas import tpu as pltpu


def qcritic_kernel(s_ref, a_ref, w1s_ref, w1a_ref, b1_ref, w2_ref, b2_ref,
                   w3r_ref, b3_ref, o_ref):
    mxu_dtype = w1s_ref.dtype  # f32 or bf16 (set by the wrapper)

    # ---- Layer 1: concat fused as a split matmul ----------------------------
    # [s | a] @ w1  ==  s @ w1[:Ds] + a @ w1[Ds:]
    s = s_ref[...].astype(mxu_dtype)
    a = a_ref[...].astype(mxu_dtype)
    h1 = jnp.dot(s, w1s_ref[...], preferred_element_type=jnp.float32)
    h1 = h1 + jnp.dot(a, w1a_ref[...], preferred_element_type=jnp.float32)
    h1 = jnp.maximum(h1 + b1_ref[...], 0.0)            # bias/ReLU in f32

    # ---- Layer 2 -------------------------------------------------------------
    h2 = jnp.dot(h1.astype(mxu_dtype), w2_ref[...],
                 preferred_element_type=jnp.float32)
    h2 = jnp.maximum(h2 + b2_ref[...], 0.0)

    # ---- Output layer: lane-dense q ------------------------------------------
    # Contract H between w3_row [1,H] and h2 [Bt,H]  ->  [1, Bt]
    # (batch lands on the lane axis, so the store below is a full-width vst).
    q = jax.lax.dot_general(
        w3r_ref[...], h2.astype(mxu_dtype),
        dimension_numbers=(((1,), (1,)), ((), ())),
        preferred_element_type=jnp.float32)
    o_ref[...] = (q + b3_ref[0]).astype(o_ref.dtype)    # b3 read from SMEM


def qcritic_forward(state, action, params, *, mxu_dtype=jnp.float32,
                    max_block_rows=1024):
    """Equivalent of QCritic.forward: q(cat(state, action)).squeeze(-1)."""
    w1, b1, w2, b2, w3, b3 = params
    B, Ds = state.shape
    Da = action.shape[-1]
    H = w1.shape[1]
    assert max_block_rows % 128 == 0

    # Concat is fused into the kernel: split w1 along its input axis instead.
    w1_s = w1[:Ds].astype(mxu_dtype)
    w1_a = w1[Ds:].astype(mxu_dtype)
    w2_c = w2.astype(mxu_dtype)
    w3_row = w3.reshape(1, H).astype(mxu_dtype)          # [H,1] -> [1,H]
    b1_c = b1.reshape(1, H).astype(jnp.float32)
    b2_c = b2.reshape(1, H).astype(jnp.float32)
    b3_s = b3.reshape(-1).astype(jnp.float32)            # (1,) scalar in SMEM

    # Batch tiling: one call, weights resident across grid steps.
    if B <= max_block_rows:
        bt = B                                           # single full block
    else:
        bt = max_block_rows                              # multiple of 128
    padded_b = pl.cdiv(B, bt) * bt
    if padded_b != B:
        pad = padded_b - B
        state = jnp.pad(state, ((0, pad), (0, 0)))
        action = jnp.pad(action, ((0, pad), (0, 0)))
    grid = (padded_b // bt,)

    out = pl.pallas_call(
        qcritic_kernel,
        out_shape=jax.ShapeDtypeStruct((1, padded_b), jnp.float32),
        grid=grid,
        in_specs=[
            pl.BlockSpec((bt, Ds), lambda i: (i, 0)),    # state  tile
            pl.BlockSpec((bt, Da), lambda i: (i, 0)),    # action tile
            pl.BlockSpec((Ds, H), lambda i: (0, 0)),     # w1[:Ds]   (resident)
            pl.BlockSpec((Da, H), lambda i: (0, 0)),     # w1[Ds:]   (resident)
            pl.BlockSpec((1, H), lambda i: (0, 0)),      # b1        (resident)
            pl.BlockSpec((H, H), lambda i: (0, 0)),      # w2        (resident)
            pl.BlockSpec((1, H), lambda i: (0, 0)),      # b2        (resident)
            pl.BlockSpec((1, H), lambda i: (0, 0)),      # w3 row    (resident)
            pl.BlockSpec(memory_space=pltpu.SMEM),       # b3 scalar
        ],
        out_specs=pl.BlockSpec((1, bt), lambda i: (0, i)),  # lane-dense output
        compiler_params=pltpu.CompilerParams(
            dimension_semantics=("parallel",)),
    )(state, action, w1_s, w1_a, b1_c, w2_c, b2_c, w3_row, b3_s)

    # torch .squeeze(-1): [1, padded_B] -> [B]
    return out[0, :B]


def init_mlp_params(key, network_sizes):
    """Deterministic PyTorch-Linear-style init: U(-1/sqrt(fan_in), 1/sqrt(fan_in))."""
    params = []
    for d_in, d_out in zip(network_sizes[:-1], network_sizes[1:]):
        key, kw, kb = jax.random.split(key, 3)
        bound = 1.0 / jnp.sqrt(d_in)
        w = jax.random.uniform(kw, (d_in, d_out), jnp.float32, -bound, bound)
        b = jax.random.uniform(kb, (1, d_out), jnp.float32, -bound, bound)
        params.extend([w, b])
    return tuple(params)


def _reference(state, action, params):
    s_a = jnp.concatenate([state, action], axis=-1)
    w1, b1, w2, b2, w3, b3 = params
    h = jnp.maximum(s_a @ w1 + b1, 0.0)
    h = jnp.maximum(h @ w2 + b2, 0.0)
    return (h @ w3 + b3).squeeze(-1)


if __name__ == "__main__":
    # network_sizes = [state_dim + action_dim, hidden, hidden, 1]
    batch = 8
    state_dim = 12
    action_dim = 4
    hidden = 32
    network_sizes = [state_dim + action_dim, hidden, hidden, 1]

    key = jax.random.PRNGKey(0)
    k_state, k_action, k_params = jax.random.split(key, 3)

    state = jax.random.normal(k_state, (batch, state_dim), jnp.float32)
    action = jax.random.normal(k_action, (batch, action_dim), jnp.float32)
    params = init_mlp_params(k_params, network_sizes)

    ref = _reference(state, action, params)

    # f32 MXU path (exact check).
    q_values = qcritic_forward(state, action, params)
    jax.block_until_ready(q_values)
    assert q_values.shape == (batch,)
    assert jnp.allclose(q_values, ref, atol=1e-5, rtol=1e-5)

    # bf16-in / f32-accumulate MXU path (v5e/v6e/v7x fast path), looser tolerance.
    q_bf16 = qcritic_forward(state, action, params, mxu_dtype=jnp.bfloat16)
    jax.block_until_ready(q_bf16)
    assert jnp.allclose(q_bf16, ref, atol=1e-1, rtol=1e-1)

    # Multi-block grid path: batch tiled (128 rows/block), padded, "parallel" axis.
    big_b = 300  # deliberately not a multiple of the tile size
    kb_s, kb_a = jax.random.split(jax.random.PRNGKey(1))
    big_state = jax.random.normal(kb_s, (big_b, state_dim), jnp.float32)
    big_action = jax.random.normal(kb_a, (big_b, action_dim), jnp.float32)
    q_big = qcritic_forward(big_state, big_action, params, max_block_rows=128)
    jax.block_until_ready(q_big)
    assert q_big.shape == (big_b,)
    assert jnp.allclose(q_big, _reference(big_state, big_action, params),
                        atol=1e-5, rtol=1e-5)

    print("KERNEL_OK")
</pallas_src>

<mosaic_0001>
module attributes {stable_mosaic.version = 11 : i64} {
  func.func @qcritic_kernel(%arg0: i32, %arg1: memref<8x12xf32, #tpu.memory_space<vmem>>, %arg2: memref<8x4xf32, #tpu.memory_space<vmem>>, %arg3: memref<12x32xf32, #tpu.memory_space<vmem>>, %arg4: memref<4x32xf32, #tpu.memory_space<vmem>>, %arg5: memref<1x32xf32, #tpu.memory_space<vmem>>, %arg6: memref<32x32xf32, #tpu.memory_space<vmem>>, %arg7: memref<1x32xf32, #tpu.memory_space<vmem>>, %arg8: memref<1x32xf32, #tpu.memory_space<vmem>>, %arg9: memref<1xf32, #tpu.memory_space<smem>>, %arg10: memref<1x8xf32, #tpu.memory_space<vmem>>) attributes {dimension_semantics = [#tpu.dimension_semantics<parallel>], iteration_bounds = array<i64: 1>, scalar_prefetch = 0 : i64, scratch_operands = 0 : i64, tpu.core_type = #tpu.core_type<tc>, window_params = [{transform_indices = @transform_0, window_bounds = array<i64: 8, 12>}, {transform_indices = @transform_1, window_bounds = array<i64: 8, 4>}, {pipeline_mode = #tpu.pipeline_mode<synchronous>, transform_indices = @transform_2, window_bounds = array<i64: 12, 32>}, {pipeline_mode = #tpu.pipeline_mode<synchronous>, transform_indices = @transform_3, window_bounds = array<i64: 4, 32>}, {pipeline_mode = #tpu.pipeline_mode<synchronous>, transform_indices = @transform_4, window_bounds = array<i64: 1, 32>}, {pipeline_mode = #tpu.pipeline_mode<synchronous>, transform_indices = @transform_5, window_bounds = array<i64: 32, 32>}, {pipeline_mode = #tpu.pipeline_mode<synchronous>, transform_indices = @transform_6, window_bounds = array<i64: 1, 32>}, {pipeline_mode = #tpu.pipeline_mode<synchronous>, transform_indices = @transform_7, window_bounds = array<i64: 1, 32>}, {transform_indices = @transform_8, window_bounds = array<i64: 1>}, {transform_indices = @transform_9, window_bounds = array<i64: 1, 8>}]} {
    %c0 = arith.constant 0 : index
    %c0_0 = arith.constant 0 : index
    %0 = vector.load %arg1[%c0, %c0_0] : memref<8x12xf32, #tpu.memory_space<vmem>>, vector<8x12xf32>
    %c0_1 = arith.constant 0 : index
    %c0_2 = arith.constant 0 : index
    %1 = vector.load %arg2[%c0_1, %c0_2] : memref<8x4xf32, #tpu.memory_space<vmem>>, vector<8x4xf32>
    %c0_3 = arith.constant 0 : index
    %c0_4 = arith.constant 0 : index
    %2 = vector.load %arg3[%c0_3, %c0_4] : memref<12x32xf32, #tpu.memory_space<vmem>>, vector<12x32xf32>
    %cst = arith.constant dense<0.000000e+00> : vector<8x32xf32>
    %3 = tpu.matmul %0, %2, %cst {dimension_numbers = #tpu.dot_dimension_numbers<[1], [0], [0], [1], [0, 0, 1, 1], [], []>} : vector<8x12xf32>, vector<12x32xf32>, vector<8x32xf32> -> vector<8x32xf32>
    %c0_5 = arith.constant 0 : index
    %c0_6 = arith.constant 0 : index
    %4 = vector.load %arg4[%c0_5, %c0_6] : memref<4x32xf32, #tpu.memory_space<vmem>>, vector<4x32xf32>
    %cst_7 = arith.constant dense<0.000000e+00> : vector<8x32xf32>
    %5 = tpu.matmul %1, %4, %cst_7 {dimension_numbers = #tpu.dot_dimension_numbers<[1], [0], [0], [1], [0, 0, 1, 1], [], []>} : vector<8x4xf32>, vector<4x32xf32>, vector<8x32xf32> -> vector<8x32xf32>
    %6 = arith.addf %3, %5 : vector<8x32xf32>
    %c0_8 = arith.constant 0 : index
    %c0_9 = arith.constant 0 : index
    %7 = vector.load %arg5[%c0_8, %c0_9] : memref<1x32xf32, #tpu.memory_space<vmem>>, vector<1x32xf32>
    %8 = vector.broadcast %7 : vector<1x32xf32> to vector<8x32xf32>
    %9 = arith.addf %6, %8 : vector<8x32xf32>
    %cst_10 = arith.constant 0.000000e+00 : f32
    %10 = vector.broadcast %cst_10 : f32 to vector<8x32xf32>
    %11 = arith.maximumf %9, %10 : vector<8x32xf32>
    %c0_11 = arith.constant 0 : index
    %c0_12 = arith.constant 0 : index
    %12 = vector.load %arg6[%c0_11, %c0_12] : memref<32x32xf32, #tpu.memory_space<vmem>>, vector<32x32xf32>
    %cst_13 = arith.constant dense<0.000000e+00> : vector<8x32xf32>
    %13 = tpu.matmul %11, %12, %cst_13 {dimension_numbers = #tpu.dot_dimension_numbers<[1], [0], [0], [1], [0, 0, 1, 1], [], []>} : vector<8x32xf32>, vector<32x32xf32>, vector<8x32xf32> -> vector<8x32xf32>
    %c0_14 = arith.constant 0 : index
    %c0_15 = arith.constant 0 : index
    %14 = vector.load %arg7[%c0_14, %c0_15] : memref<1x32xf32, #tpu.memory_space<vmem>>, vector<1x32xf32>
    %15 = vector.broadcast %14 : vector<1x32xf32> to vector<8x32xf32>
    %16 = arith.addf %13, %15 : vector<8x32xf32>
    %cst_16 = arith.constant 0.000000e+00 : f32
    %17 = vector.broadcast %cst_16 : f32 to vector<8x32xf32>
    %18 = arith.maximumf %16, %17 : vector<8x32xf32>
    %c0_17 = arith.constant 0 : index
    %c0_18 = arith.constant 0 : index
    %19 = vector.load %arg8[%c0_17, %c0_18] : memref<1x32xf32, #tpu.memory_space<vmem>>, vector<1x32xf32>
    %cst_19 = arith.constant dense<0.000000e+00> : vector<1x8xf32>
    %20 = tpu.matmul %19, %18, %cst_19 {dimension_numbers = #tpu.dot_dimension_numbers<[1], [1], [0], [0], [0, 0, 1, 0], [], []>} : vector<1x32xf32>, vector<8x32xf32>, vector<1x8xf32> -> vector<1x8xf32>
    %c0_20 = arith.constant 0 : index
    %21 = memref.load %arg9[%c0_20] : memref<1xf32, #tpu.memory_space<smem>>
    %22 = vector.broadcast %21 : f32 to vector<1x8xf32>
    %23 = arith.addf %20, %22 : vector<1x8xf32>
    %c0_21 = arith.constant 0 : index
    %c0_22 = arith.constant 0 : index
    %24 = vector.load %arg10[%c0_21, %c0_22] : memref<1x8xf32, #tpu.memory_space<vmem>>, vector<1x8xf32>
    tpu.vector_store %arg10[%c0_21, %c0_22], %23 {strides = array<i32>} : memref<1x8xf32, #tpu.memory_space<vmem>>, vector<1x8xf32>,
    return
  }
  func.func @transform_0(%arg0: i32) -> (i32, i32) {
    %c0_i32 = arith.constant 0 : i32
    %c0_i32_0 = arith.constant 0 : i32
    return %arg0, %c0_i32 : i32, i32
  }
  func.func @transform_1(%arg0: i32) -> (i32, i32) {
    %c0_i32 = arith.constant 0 : i32
    %c0_i32_0 = arith.constant 0 : i32
    return %arg0, %c0_i32 : i32, i32
  }
  func.func @transform_2(%arg0: i32) -> (i32, i32) {
    %c0_i32 = arith.constant 0 : i32
    %c0_i32_0 = arith.constant 0 : i32
    %c0_i32_1 = arith.constant 0 : i32
    return %c0_i32, %c0_i32_0 : i32, i32
  }
  func.func @transform_3(%arg0: i32) -> (i32, i32) {
    %c0_i32 = arith.constant 0 : i32
    %c0_i32_0 = arith.constant 0 : i32
    %c0_i32_1 = arith.constant 0 : i32
    return %c0_i32, %c0_i32_0 : i32, i32
  }
  func.func @transform_4(%arg0: i32) -> (i32, i32) {
    %c0_i32 = arith.constant 0 : i32
    %c0_i32_0 = arith.constant 0 : i32
    %c0_i32_1 = arith.constant 0 : i32
    return %c0_i32, %c0_i32_0 : i32, i32
  }
  func.func @transform_5(%arg0: i32) -> (i32, i32) {
    %c0_i32 = arith.constant 0 : i32
    %c0_i32_0 = arith.constant 0 : i32
    %c0_i32_1 = arith.constant 0 : i32
    return %c0_i32, %c0_i32_0 : i32, i32
  }
  func.func @transform_6(%arg0: i32) -> (i32, i32) {
    %c0_i32 = arith.constant 0 : i32
    %c0_i32_0 = arith.constant 0 : i32
    %c0_i32_1 = arith.constant 0 : i32
    return %c0_i32, %c0_i32_0 : i32, i32
  }
  func.func @transform_7(%arg0: i32) -> (i32, i32) {
    %c0_i32 = arith.constant 0 : i32
    %c0_i32_0 = arith.constant 0 : i32
    %c0_i32_1 = arith.constant 0 : i32
    return %c0_i32, %c0_i32_0 : i32, i32
  }
  func.func @transform_8(%arg0: i32) -> i32 {
    %c0_i32 = arith.constant 0 : i32
    %c0_i32_0 = arith.constant 0 : i32
    return %c0_i32 : i32
  }
  func.func @transform_9(%arg0: i32) -> (i32, i32) {
    %c0_i32 = arith.constant 0 : i32
    %c0_i32_0 = arith.constant 0 : i32
    return %c0_i32, %arg0 : i32, i32
  }
}

</mosaic_0001>

<bundles_post_ra>
// kernel: tpu_custom_call.1
= control target key start
LH: loop header
LB: loop body
LE: loop exit
PB: predicated region body
PF: predicated region fallthrough
CT: control target
= control target key end

     0   :  { %15 = vsyncpa [#allocation4], 0  ;;  %s725_s0 = inlined_call_operand.hbm [shape: f32[8,12], index: 0, kind: input, shape index: {}]   ;;  %s726_s1 = inlined_call_operand.vmem [shape: f32[8,4], index: 1, kind: input, shape index: {}]   ;;  %s727_s2 = inlined_call_operand.hbm [shape: f32[12,32], index: 2, kind: input, shape index: {}]   ;;  %s728_s3 = inlined_call_operand.hbm [shape: f32[4,32], index: 3, kind: input, shape index: {}]   ;;  %s729_s4 = inlined_call_operand.vmem [shape: f32[1,32], index: 4, kind: input, shape index: {}]   ;;  %s730_s5 = inlined_call_operand.vmem [shape: f32[32,32], index: 5, kind: input, shape index: {}]   ;;  %s731_s6 = inlined_call_operand.vmem [shape: f32[1,32], index: 6, kind: input, shape index: {}]   ;;  %s732_s7 = inlined_call_operand.vmem [shape: f32[1,32], index: 7, kind: input, shape index: {}]   ;;  %s733_s8 = inlined_call_operand.<no memory space> [shape: f32[1], index: 8, kind: input, shape index: {}]   ;;  %s734_s9 = inlined_call_operand.hbm [shape: f32[1,8], index: 9, kind: output, shape index: {}]  }
   0x1   :  { %16 = vsyncpa [#allocation7], 0 }
   0x2   :  { %17 = vsyncpa [#allocation5], 0  ;;  %s586_s30 = smov [#allocation6]   ;;  %s492_s13 = scalar_lea.hbm %s727_s2, 256 }
   0x3   :  { %s35_s10 = sshll.u32 %s586_s30, 4  ;;  %p493_p0 = scmp.ne.s32.totalorder %s727_s2, %s492_s13  ;;  %s36_s10 = int_to_ptr.vmem [resolvable:$true] %s35_s10 }
   0x4   :  { %p496_p1 = scmp.lt.u32.totalorder %s492_s13, %s727_s2 }
   0x6   :  { %p498_p2 = pnand %p496_p1, %p493_p0 }
   0x8   :  { %501 = shalt.err (!%p498_p2)
}
   0x9   :  { %s502_s18 = scalar_lea.vmem %s36_s10, 256  ;;  %p507_p4 = scmp.lt.s32.totalorder %s36_s10, %s36_s10 }
   0xa   :  { %p503_p3 = scmp.ne.s32.totalorder %s36_s10, %s502_s18  ;;  %p508_p5 = scmp.lt.s32.totalorder %s502_s18, %s502_s18 }
   0xc   :  { %p509_p6 = por %p508_p5, %p507_p4 }
   0xe   :  { %p510_p7 = pnand %p509_p6, %p503_p3 }
  0x10   :  { %513 = shalt.err (!%p510_p7)
}
  0x11   :  { %s587_s19 = smov 128   ;;  %s588_s20 = smov 8  }
  0x12   :  { %41 = dma.hbm_to_vmem [thread:$0]  %s727_s2, 256, %s36_s10, [#allocation7], %s587_s19, %s587_s19, %s588_s20  }
  0x13   :  { %s589_s23 = smov [#allocation3]   ;;  %s590_s25 = smov [#allocation8]  }
  0x14   :  { %s24_s24 = sshll.u32 %s589_s23, 4  ;;  %s48_s26 = sshll.u32 %s590_s25, 4  ;;  %s25_s24 = int_to_ptr.vmem [resolvable:$true] %s24_s24  ;;  %s49_s26 = int_to_ptr.vmem [resolvable:$true] %s48_s26 }
  0x15   :  { %s514_s29 = scalar_lea.hbm %s725_s0, 128 }
  0x16   :  { %p515_p8 = scmp.ne.s32.totalorder %s725_s0, %s514_s29  ;;  %p518_p9 = scmp.lt.u32.totalorder %s514_s29, %s725_s0 }
  0x18   :  { %p520_p10 = pnand %p518_p9, %p515_p8 }
  0x1a   :  { %523 = shalt.err (!%p520_p10)
}
  0x1b   :  { %s524_s2 = scalar_lea.vmem %s25_s24, 128  ;;  %p529_p12 = scmp.lt.s32.totalorder %s25_s24, %s25_s24 }
  0x1c   :  { %p525_p11 = scmp.ne.s32.totalorder %s25_s24, %s524_s2  ;;  %p530_p13 = scmp.lt.s32.totalorder %s524_s2, %s524_s2 }
  0x1e   :  { %p531_p0 = por %p530_p13, %p529_p12 }
  0x20   :  { %p532_p1 = pnand %p531_p0, %p525_p11 }
  0x22   :  { %535 = shalt.err (!%p532_p1)
}
  0x23   :  { %27 = dma.hbm_to_vmem [thread:$0]  %s725_s0, 128, %s25_s24, [#allocation4]  }
  0x24   :  { %s536_s17 = scalar_lea.hbm %s728_s3, 64 }
  0x25   :  { %p537_p2 = scmp.ne.s32.totalorder %s728_s3, %s536_s17  ;;  %p540_p3 = scmp.lt.u32.totalorder %s536_s17, %s728_s3 }
  0x27   :  { %p542_p4 = pnand %p540_p3, %p537_p2 }
  0x29   :  { %545 = shalt.err (!%p542_p4)
}
  0x2a   :  { %s546_s22 = scalar_lea.vmem %s49_s26, 64  ;;  %p551_p6 = scmp.lt.s32.totalorder %s49_s26, %s49_s26 }
  0x2b   :  { %p547_p5 = scmp.ne.s32.totalorder %s49_s26, %s546_s22  ;;  %p552_p7 = scmp.lt.s32.totalorder %s546_s22, %s546_s22 }
  0x2d   :  { %p553_p8 = por %p552_p7, %p551_p6 }
  0x2f   :  { %p554_p9 = pnand %p553_p8, %p547_p5 }
  0x31   :  { %557 = shalt.err (!%p554_p9)
}
  0x32   :  { %51 = dma.hbm_to_vmem [thread:$0]  %s728_s3, 64, %s49_s26, [#allocation7]  }
  0x33   :  { %580 = dma.done.wait [#allocation4], 128  }
  0x34   :  { %581 = vsyncadd [#allocation4], 4294967168 }
  0x35   :  { %582 = dma.done.wait [#allocation7], 320  }
  0x36   :  { %583 = vsyncadd [#allocation7], 4294966976  ;;  %v591_v0 = vmov 0.0|0.0   ;;  %v592_v1 = vmov 0.0   ;;  %vm593_vm0 = vmmov 0   ;;  %vm80_vm1 = vcmask 1043456  }
  0x37   :  { %472 = vmatprep.subr.bf16.mxu1 %v591_v0  ;;  %444 = vmatprep.subr.mxu0 %v592_v1  ;;  %vm594_vm2 = vmmov 1   ;;  %vm76_vm4 = vcmask 31744   ;;  %v73_v2 = vld [vmem:[#allocation6] sm:$0xff]  ;;  %v74_v3 = vld [vmem:[#allocation6 + $0x8] sm:$0xf]  ;;  %v72_v6 = vld [vmem:[%s726_s1] sm:$0xff]  ;;  %v328_v28 = vstv %s733_s8 }
  0x38   :  { %446 = vmatprep.mubr.msk.f32.mxu0 %vm593_vm0, %v592_v1  ;;  %453 = vmatprep.mubr.msk.f32.mxu1 %vm593_vm0, %v592_v1  ;;  %vm474_vm3 = vmpackc.low %vm80_vm1, %vm594_vm2  ;;  %v75_v4 = vld [vmem:[#allocation8] sm:$0xf]  ;;  %v473_v5 = vpack.c.bf16 %v74_v3, %v73_v2  ;;  %v71_v7 = vld [vmem:[#allocation3] sm:$0xff]  ;;  %vm154_vm5 = vcmask 97280   ;;  %vm251_vm6 = vcmask 261120   ;;  %s595_s16 = smov [#allocation9]  }
  0x39   :  { %445 = vmatpush3.msk.msra.mxu0 %vm80_vm1, %v75_v4  ;;  %v240_v8 = vld [vmem:[%s730_s5] sm:$0xff]  ;;  %v241_v9 = vld [vmem:[%s730_s5 + $0x8] sm:$0xff]  ;;  %v242_v11 = vld [vmem:[%s730_s5 + $0x10] sm:$0xff]  ;;  %s413_s17 = sshll.u32 %s595_s16, 4  ;;  %vm405_vm7 = vcmask 57344   ;;  %s414_s17 = int_to_ptr.vmem [resolvable:$true] %s413_s17 }
  0x3a   :  { %447 = vmatmul.mubr.msk.f32.vlgmr.msra.gmra.mrb[0].mxu0 %vm76_vm4, %v72_v6  ;;  %476 = vmatprep.subr.bf16.mxu0 %v591_v0  ;;  %v477_v10 = vpack.c.bf16 %v241_v9, %v240_v8  ;;  %v243_v12 = vld [vmem:[%s730_s5 + $0x18] sm:$0xff]  ;;  %v427_v17 = vld [vmem:[%s729_s4] ss:$0 sm:$0xff]  ;;  %s562_s18 = scalar_lea.vmem %s414_s17, 32  ;;  %p563_p11 = scmp.lt.s32.totalorder %s414_s17, %s414_s17 }
  0x3b   :  { %475 = vmatpush3.bf16.msk.msra.mxu1 %vm474_vm3, %v473_v5  ;;  %464 = vmatprep.mubr.msk.f32.mxu0 %vm593_vm0, %v592_v1  ;;  %v480_v13 = vpack.c.bf16 %v243_v12, %v242_v11  ;;  %v428_v22 = vld [vmem:[%s731_s6] ss:$0 sm:$0xff]  ;;  %s558_s6 = scalar_lea.vmem %s414_s17, 16 }
  0x3c   :  { %467 = vmatprep.subr.mxu1 %v592_v1  ;;  %478 = vmatpush3.bf16.msra.mxu0 %v477_v10  ;;  %v326_v27 = vld [vmem:[%s732_s7] sm:$0x1]  ;;  %p559_p10 = scmp.ne.s32.totalorder %s414_s17, %s558_s6  ;;  %p564_p12 = scmp.lt.s32.totalorder %s562_s18, %s558_s6 }
  0x3d   :  { %479 = vmatprep.subr.bf16.mxu0 %v591_v0 }
  0x3e   :  { %454 = vmatmul.mubr.msk.f32.vlgmr.msra.gmra.mrb[0].mxu1 %vm154_vm5, %v71_v7  ;;  %p565_p13 = por %p564_p12, %p563_p11 }
  0x3f   :  { %469 = vmatprep.mubr.msk.f32.mxu1 %vm593_vm0, %v592_v1 }
  0x40   :  { %481 = vmatpush3.bf16.msra.mxu0 %v480_v13  ;;  %p566_p0 = pnand %p565_p13, %p559_p10 }
 0x10d   :  { %v150_v14 = vpop.f32.mrb[0].mxu0 }
 0x10e   :  { %v448_v15 = vpop.f32.mrb[1].mxu0 }
 0x111   :  { %v227_v16 = vpop.f32.mrb[0].mxu1 }
 0x112   :  { %v228_v18 = vadd.f32 %v227_v16, %v150_v14  ;;  %v455_v19 = vpop.f32.mrb[1].mxu1 }
 0x114   :  { %v238_v20 = vadd.f32 %v427_v17, %v228_v18 }
 0x116   :  { %v239_v21 = vmax.f32 %v238_v20, 0.0 }
 0x118   :  { %465 = vmatmul.mubr.msk.f32.vlgmr.msra.gmra.mrb[2].mxu0 %vm251_vm6, %v239_v21 }
 0x1eb   :  { %v321_v23 = vpop.f32.mrb[2].mxu0 }
 0x1ec   :  { %v322_v24 = vadd.f32 %v428_v22, %v321_v23  ;;  %v466_v25 = vpop.f32.mrb[3].mxu0 }
 0x1ee   :  { %v325_v26 = vmax.f32 %v322_v24, 0.0 }
 0x1f0   :  { %468 = vmatpush3.xpose.msk.msra.mxu1 %vm251_vm6, %v325_v26 }
 0x1f3   :  { %470 = vmatmul.mubr.msk.f32.vlgmr.msra.gmra.mrb[2].mxu1 %vm251_vm6, %v326_v27 }
 0x2c6   :  { %v401_v29 = vpop.f32.mrb[2].mxu1 }
 0x2c7   :  { %v402_v30 = vadd.f32 %v401_v29, %v328_v28  ;;  %v471_v31 = vpop.f32.mrb[3].mxu1 }
 0x2c9   :  { %406 = vst.msk [vmem:[#allocation9] sm:$0x1] %vm405_vm7, %v402_v30 }
 0x2ca   :  { %569 = shalt.err (!%p566_p0)
}
 0x2cb   :  { %s570_s8 = scalar_lea.hbm %s734_s9, 16 }
 0x2cc   :  { %p571_p1 = scmp.ne.s32.totalorder %s734_s9, %s570_s8  ;;  %p574_p2 = scmp.lt.u32.totalorder %s570_s8, %s734_s9 }
 0x2ce   :  { %p576_p3 = pnand %p574_p2, %p571_p1 }
 0x2d0   :  { %579 = shalt.err (!%p576_p3)
}
 0x2d1   :  { %416 = dma.vmem_to_hbm [thread:$0]  %s414_s17, 16, %s734_s9, [#allocation5]  }
 0x2d2   :  { %584 = dma.done.wait [#allocation5], 16  }
 0x2d3   :  { %585 = vsyncadd [#allocation5], 4294967280 }
 0x2d4   :  { %420 = vsyncpa [#allocation4], 1 }
 0x2d5   :  { %421 = vsyncpa [#allocation7], 1 }
 0x2d6   :  { %422 = vsyncpa [#allocation5], 1 }

</bundles_post_ra>
